<compile_context>
chip_gen: v7x
topology: tpu7x:2x2x1
jax: 0.10.0
libtpu: 0.0.40
codegen_flags: <defaults>
</compile_context>

<pallas_src>
import functools
import numpy as np

import jax
import jax.numpy as jnp
from jax.experimental import pallas as pl
from jax.experimental.pallas import tpu as pltpu


def _gat_kernel(xT_ref, waugT_ref, adjT_ref, adjd_ref, sel_ref, slabeq_ref,
                o_ref, *, alpha, concat):
    # xT_ref:     (Cin, R)   node instances (b, l, i) on lanes
    # waugT_ref:  (F+2, Cin) [W | W@a1 | W@a2]^T
    # adjT_ref:   (N, R)     [j, (b,l,i)] = adj[i, j]
    # adjd_ref:   (1, R)     [0, (b,l,i)] = adj[i, i]
    # sel_ref:    (N, R)     [j, k] = 1 if k % N == j
    # slabeq_ref: (R, R)     [k, c] = 1 if k // N == c // N
    # o_ref:      (F, R)
    fo = waugT_ref.shape[0] - 2          # out_features

    # One MXU push over all B*L*N node instances (lanes):
    # rows 0..F-1 = Wh, row F = Wh.a1 (s1), row F+1 = Wh.a2 (s2).
    y = jnp.dot(waugT_ref[...], xT_ref[...],
                preferred_element_type=jnp.float32)              # (F+2, R)
    wh = y[:fo, :]                                               # (F, R)
    s1 = y[fo:fo + 1, :]                                         # (1, R)
    s2 = y[fo + 1:fo + 2, :]                                     # (1, R)

    # Per-slab broadcast of s2 on the MXU with 0/1 selection constants
    # (no transposes / lane reshapes):  s2_slabT[j, c] = s2[0, (c//N)*N + j].
    lhs = sel_ref[...] * s2                                      # (N, R)
    s2_slabT = jnp.dot(lhs, slabeq_ref[...],
                       preferred_element_type=jnp.float32)       # (N, R)

    # Masked attention logits on a lane-dense (N, R) tile; softmax statistics
    # reduce over sublanes straight into (1, R) rows.
    est = s1 + s2_slabT                                          # e[b,l,i,j] at [j, c]
    est = jnp.where(est > 0, est, alpha * est)                   # LeakyReLU
    est = jnp.where(adjT_ref[...] > 0, est, -9.0e15)
    m = jnp.max(est, axis=0, keepdims=True)                      # (1, R)
    denom = jnp.sum(jnp.exp(est - m), axis=0, keepdims=True)     # (1, R)

    # Diagonal attention weight (the only part consumed by 'bnnl,bnvl->bnvl'),
    # with the adj-diagonal mask kept so graphs without self-loops match the
    # reference exactly.
    e_d = s1 + s2                                                # (1, R)
    e_d = jnp.where(e_d > 0, e_d, alpha * e_d)
    e_d = jnp.where(adjd_ref[...] > 0, e_d, -9.0e15)
    # exact reciprocal: approx=True (EUP vrcp) does not meet the 1e-5 rtol check
    att_d = jnp.exp(e_d - m) * pl.reciprocal(denom)              # (1, R)
    # TODO(synk): F.dropout on the attention is skipped (inference semantics).

    hp = att_d * wh                                              # (F, R)
    if concat:                                                   # ELU (overflow-safe exp)
        hp = jnp.where(hp > 0, hp, jnp.exp(jnp.minimum(hp, 0.0)) - 1.0)

    o_ref[...] = hp.astype(o_ref.dtype)                          # lane-dense unmasked store


def graph_attention_layer(h, adj, W, a, *, alpha=0.2, concat=True):
    """h: (B, in_features, N, L); adj: (N, N); W: (Cin, F); a: (2F, 1)."""
    B, Cin, N, L = h.shape
    F = W.shape[1]
    BL = B * L
    R = BL * N                                       # fused node-instance axis (lanes)
    Rp = max(128, ((R + 127) // 128) * 128)          # keep lanes a multiple of 128

    # Fold attention vectors into the weight and pre-transpose so the matmul
    # directly produces the (F rows, node lanes) output layout.
    waugT = jnp.concatenate([W, W @ a[:F, :], W @ a[F:, :]], axis=1).T    # (F+2, Cin)

    # Input as (Cin, R) with lanes flattened (b, l, i): xT[:, (b*L+l)*N+i] = h[b,:,i,l]
    xT = jnp.transpose(h, (1, 0, 3, 2)).reshape(Cin, R)

    # Adjacency pre-tiled for the lane-dense stats tile and the diagonal path.
    adjT = jnp.tile(adj.T, (1, BL))                           # (N, R): [j, t*N+i] = adj[i, j]
    adjd = jnp.tile(jnp.diag(adj), BL).reshape(1, R)          # (1, R): [0, t*N+i] = adj[i, i]

    if Rp != R:   # zero-pad the fused axis to a lane multiple (no-op at the test shape)
        xT = jnp.pad(xT, ((0, 0), (0, Rp - R)))
        adjT = jnp.pad(adjT, ((0, 0), (0, Rp - R)))
        adjd = jnp.pad(adjd, ((0, 0), (0, Rp - R)))

    # 0/1 selection constants for the in-kernel per-slab rearrangement of s2:
    #   s2_slabT = (sel * s2) @ slabeq  =>  s2_slabT[j, c] = s2[(c//N)*N + j]
    iN = np.arange(N)
    iR = np.arange(Rp)
    sel = jnp.asarray((iR[None, :] % N == iN[:, None]).astype(np.float32))           # (N, Rp)
    slabeq = jnp.asarray((iR[:, None] // N == iR[None, :] // N).astype(np.float32))  # (Rp, Rp)

    kernel = functools.partial(_gat_kernel, alpha=alpha, concat=concat)

    out = pl.pallas_call(
        kernel,
        out_shape=jax.ShapeDtypeStruct((F, Rp), jnp.float32),
        grid=(1,),                       # single fused step: no per-step pipeline overhead
        in_specs=[
            pl.BlockSpec((Cin, Rp), lambda i: (0, 0)),
            pl.BlockSpec((F + 2, Cin), lambda i: (0, 0)),
            pl.BlockSpec((N, Rp), lambda i: (0, 0)),
            pl.BlockSpec((1, Rp), lambda i: (0, 0)),
            pl.BlockSpec((N, Rp), lambda i: (0, 0)),
            pl.BlockSpec((Rp, Rp), lambda i: (0, 0)),
        ],
        out_specs=pl.BlockSpec((F, Rp), lambda i: (0, 0)),
        compiler_params=pltpu.CompilerParams(
            dimension_semantics=("arbitrary",)),
    )(xT, waugT, adjT, adjd, sel, slabeq)

    # (F, R) with lanes (b, l, i)  ->  (B, out_features, N, L)  (PyTorch layout)
    return jnp.transpose(out[:, :R].reshape(F, B, L, N), (1, 0, 3, 2))


def reference(h, adj, W, a, alpha, concat=True):
    """Pure-JAX transcription of the PyTorch forward (eval mode)."""
    F_out = W.shape[1]
    hp = jnp.transpose(h, (0, 2, 1, 3))                       # (B, N, Cin, L)
    Wh = jnp.einsum('bnwl,wv->bnvl', hp, W)                   # (B, N, F, L)
    Wh1 = jnp.einsum('bnvl,vi->bnil', Wh, a[:F_out, :])
    Wh2 = jnp.einsum('bnvl,vi->bnil', Wh, a[F_out:, :])
    e = Wh1 + jnp.transpose(Wh2, (0, 2, 1, 3))                # (B, N, N, L)
    e = jnp.where(e > 0, e, alpha * e)
    e = jnp.transpose(e, (0, 3, 1, 2))                        # (B, L, N, N)
    att = jnp.where(adj > 0, e, -9.0e15)
    att = jnp.transpose(att, (0, 2, 3, 1))                    # (B, N, N, L)
    att = jax.nn.softmax(att, axis=2)
    h_prime = jnp.einsum('bnnl,bnvl->bnvl', att, Wh)          # diagonal semantics
    h_prime = jnp.transpose(h_prime, (0, 2, 1, 3))            # (B, F, N, L)
    if concat:
        return jnp.where(h_prime > 0, h_prime, jnp.exp(h_prime) - 1.0)
    return h_prime


if __name__ == "__main__":
    B, Cin, Cout, N, L = 2, 8, 16, 16, 4
    alpha = 0.2

    key = jax.random.PRNGKey(0)
    k_w, k_a, k_h, k_adj = jax.random.split(key, 4)

    # deterministic xavier_uniform init (gain=1.414), shapes per the module
    gain = 1.414
    bw = gain * float(np.sqrt(6.0 / (Cin + Cout)))
    W = jax.random.uniform(k_w, (Cin, Cout), jnp.float32, -bw, bw)
    ba = gain * float(np.sqrt(6.0 / (2 * Cout + 1)))
    a = jax.random.uniform(k_a, (2 * Cout, 1), jnp.float32, -ba, ba)

    h = jax.random.normal(k_h, (B, Cin, N, L), jnp.float32)
    # random adjacency WITHOUT forced self-loops (exercises the diag mask path)
    adj = (jax.random.uniform(k_adj, (N, N)) > 0.5).astype(jnp.float32)

    out = graph_attention_layer(h, adj, W, a, alpha=alpha, concat=True)
    out = jax.block_until_ready(out)

    ref = jax.block_until_ready(reference(h, adj, W, a, alpha, concat=True))
    np.testing.assert_allclose(np.asarray(out), np.asarray(ref),
                               rtol=2e-5, atol=2e-5)
    print("KERNEL_OK")
</pallas_src>

<mosaic_0001>
module attributes {stable_mosaic.version = 11 : i64} {
  func.func @_gat_kernel(%arg0: i32, %arg1: memref<8x128xf32, #tpu.memory_space<vmem>>, %arg2: memref<18x8xf32, #tpu.memory_space<vmem>>, %arg3: memref<16x128xf32, #tpu.memory_space<vmem>>, %arg4: memref<1x128xf32, #tpu.memory_space<vmem>>, %arg5: memref<16x128xf32, #tpu.memory_space<vmem>>, %arg6: memref<128x128xf32, #tpu.memory_space<vmem>>, %arg7: memref<16x128xf32, #tpu.memory_space<vmem>>) attributes {dimension_semantics = [#tpu.dimension_semantics<arbitrary>], iteration_bounds = array<i64: 1>, scalar_prefetch = 0 : i64, scratch_operands = 0 : i64, tpu.core_type = #tpu.core_type<tc>, window_params = [{pipeline_mode = #tpu.pipeline_mode<synchronous>, transform_indices = @transform_0, window_bounds = array<i64: 8, 128>}, {pipeline_mode = #tpu.pipeline_mode<synchronous>, transform_indices = @transform_1, window_bounds = array<i64: 18, 8>}, {pipeline_mode = #tpu.pipeline_mode<synchronous>, transform_indices = @transform_2, window_bounds = array<i64: 16, 128>}, {pipeline_mode = #tpu.pipeline_mode<synchronous>, transform_indices = @transform_3, window_bounds = array<i64: 1, 128>}, {pipeline_mode = #tpu.pipeline_mode<synchronous>, transform_indices = @transform_4, window_bounds = array<i64: 16, 128>}, {pipeline_mode = #tpu.pipeline_mode<synchronous>, transform_indices = @transform_5, window_bounds = array<i64: 128, 128>}, {pipeline_mode = #tpu.pipeline_mode<synchronous>, transform_indices = @transform_6, window_bounds = array<i64: 16, 128>}]} {
    %c0 = arith.constant 0 : index
    %c0_0 = arith.constant 0 : index
    %0 = vector.load %arg2[%c0, %c0_0] : memref<18x8xf32, #tpu.memory_space<vmem>>, vector<18x8xf32>
    %c0_1 = arith.constant 0 : index
    %c0_2 = arith.constant 0 : index
    %1 = vector.load %arg1[%c0_1, %c0_2] : memref<8x128xf32, #tpu.memory_space<vmem>>, vector<8x128xf32>
    %cst = arith.constant dense<0.000000e+00> : vector<18x128xf32>
    %2 = tpu.matmul %0, %1, %cst {dimension_numbers = #tpu.dot_dimension_numbers<[1], [0], [0], [1], [0, 0, 1, 1], [], []>} : vector<18x8xf32>, vector<8x128xf32>, vector<18x128xf32> -> vector<18x128xf32>
    %3 = vector.extract_strided_slice %2 {offsets = [0, 0], sizes = [16, 128], strides = [1, 1]} : vector<18x128xf32> to vector<16x128xf32>
    %4 = vector.extract_strided_slice %2 {offsets = [16, 0], sizes = [1, 128], strides = [1, 1]} : vector<18x128xf32> to vector<1x128xf32>
    %5 = vector.extract_strided_slice %2 {offsets = [17, 0], sizes = [1, 128], strides = [1, 1]} : vector<18x128xf32> to vector<1x128xf32>
    %c0_3 = arith.constant 0 : index
    %c0_4 = arith.constant 0 : index
    %6 = vector.load %arg5[%c0_3, %c0_4] : memref<16x128xf32, #tpu.memory_space<vmem>>, vector<16x128xf32>
    %7 = vector.broadcast %5 : vector<1x128xf32> to vector<16x128xf32>
    %8 = arith.mulf %6, %7 : vector<16x128xf32>
    %c0_5 = arith.constant 0 : index
    %c0_6 = arith.constant 0 : index
    %9 = vector.load %arg6[%c0_5, %c0_6] : memref<128x128xf32, #tpu.memory_space<vmem>>, vector<128x128xf32>
    %cst_7 = arith.constant dense<0.000000e+00> : vector<16x128xf32>
    %10 = tpu.matmul %8, %9, %cst_7 {dimension_numbers = #tpu.dot_dimension_numbers<[1], [0], [0], [1], [0, 0, 1, 1], [], []>} : vector<16x128xf32>, vector<128x128xf32>, vector<16x128xf32> -> vector<16x128xf32>
    %11 = vector.broadcast %4 : vector<1x128xf32> to vector<16x128xf32>
    %12 = arith.addf %11, %10 : vector<16x128xf32>
    %cst_8 = arith.constant 0.000000e+00 : f32
    %13 = vector.broadcast %cst_8 : f32 to vector<16x128xf32>
    %14 = arith.cmpf ogt, %12, %13 : vector<16x128xf32>
    %cst_9 = arith.constant 2.000000e-01 : f32
    %15 = vector.broadcast %cst_9 : f32 to vector<16x128xf32>
    %16 = arith.mulf %15, %12 : vector<16x128xf32>
    %17 = arith.select %14, %12, %16 : vector<16x128xi1>, vector<16x128xf32>
    %c0_10 = arith.constant 0 : index
    %c0_11 = arith.constant 0 : index
    %18 = vector.load %arg3[%c0_10, %c0_11] : memref<16x128xf32, #tpu.memory_space<vmem>>, vector<16x128xf32>
    %cst_12 = arith.constant 0.000000e+00 : f32
    %19 = vector.broadcast %cst_12 : f32 to vector<16x128xf32>
    %20 = arith.cmpf ogt, %18, %19 : vector<16x128xf32>
    %cst_13 = arith.constant -9.000000e+15 : f32
    %21 = vector.broadcast %cst_13 : f32 to vector<16x128xf32>
    %22 = arith.select %20, %17, %21 : vector<16x128xi1>, vector<16x128xf32>
    %cst_14 = arith.constant dense<0xFF800000> : vector<128xf32>
    %23 = vector.multi_reduction <maximumf>, %22, %cst_14 [0] : vector<16x128xf32> to vector<128xf32>
    %24 = vector.shape_cast %23 : vector<128xf32> to vector<1x128xf32>
    %25 = vector.broadcast %24 : vector<1x128xf32> to vector<16x128xf32>
    %26 = arith.subf %22, %25 : vector<16x128xf32>
    %27 = math.exp %26 : vector<16x128xf32>
    %cst_15 = arith.constant dense<0.000000e+00> : vector<128xf32>
    %28 = vector.multi_reduction <add>, %27, %cst_15 [0] : vector<16x128xf32> to vector<128xf32>
    %29 = vector.shape_cast %28 : vector<128xf32> to vector<1x128xf32>
    %30 = arith.addf %4, %5 : vector<1x128xf32>
    %cst_16 = arith.constant 0.000000e+00 : f32
    %31 = vector.broadcast %cst_16 : f32 to vector<1x128xf32>
    %32 = arith.cmpf ogt, %30, %31 : vector<1x128xf32>
    %cst_17 = arith.constant 2.000000e-01 : f32
    %33 = vector.broadcast %cst_17 : f32 to vector<1x128xf32>
    %34 = arith.mulf %33, %30 : vector<1x128xf32>
    %35 = arith.select %32, %30, %34 : vector<1x128xi1>, vector<1x128xf32>
    %c0_18 = arith.constant 0 : index
    %c0_19 = arith.constant 0 : index
    %36 = vector.load %arg4[%c0_18, %c0_19] : memref<1x128xf32, #tpu.memory_space<vmem>>, vector<1x128xf32>
    %cst_20 = arith.constant 0.000000e+00 : f32
    %37 = vector.broadcast %cst_20 : f32 to vector<1x128xf32>
    %38 = arith.cmpf ogt, %36, %37 : vector<1x128xf32>
    %cst_21 = arith.constant -9.000000e+15 : f32
    %39 = vector.broadcast %cst_21 : f32 to vector<1x128xf32>
    %40 = arith.select %38, %35, %39 : vector<1x128xi1>, vector<1x128xf32>
    %41 = arith.subf %40, %24 : vector<1x128xf32>
    %42 = math.exp %41 : vector<1x128xf32>
    %43 = tpu.reciprocal %29 : vector<1x128xf32> -> vector<1x128xf32>
    %44 = arith.mulf %42, %43 : vector<1x128xf32>
    %45 = vector.broadcast %44 : vector<1x128xf32> to vector<16x128xf32>
    %46 = arith.mulf %45, %3 : vector<16x128xf32>
    %cst_22 = arith.constant 0.000000e+00 : f32
    %47 = vector.broadcast %cst_22 : f32 to vector<16x128xf32>
    %48 = arith.cmpf ogt, %46, %47 : vector<16x128xf32>
    %cst_23 = arith.constant 0.000000e+00 : f32
    %49 = vector.broadcast %cst_23 : f32 to vector<16x128xf32>
    %50 = arith.minimumf %46, %49 : vector<16x128xf32>
    %51 = math.exp %50 : vector<16x128xf32>
    %cst_24 = arith.constant 1.000000e+00 : f32
    %52 = vector.broadcast %cst_24 : f32 to vector<16x128xf32>
    %53 = arith.subf %51, %52 : vector<16x128xf32>
    %54 = arith.select %48, %46, %53 : vector<16x128xi1>, vector<16x128xf32>
    %c0_25 = arith.constant 0 : index
    %c0_26 = arith.constant 0 : index
    %55 = vector.load %arg7[%c0_25, %c0_26] : memref<16x128xf32, #tpu.memory_space<vmem>>, vector<16x128xf32>
    tpu.vector_store %arg7[%c0_25, %c0_26], %54 {strides = array<i32>} : memref<16x128xf32, #tpu.memory_space<vmem>>, vector<16x128xf32>,
    return
  }
  func.func @transform_0(%arg0: i32) -> (i32, i32) {
    %c0_i32 = arith.constant 0 : i32
    %c0_i32_0 = arith.constant 0 : i32
    %c0_i32_1 = arith.constant 0 : i32
    return %c0_i32, %c0_i32_0 : i32, i32
  }
  func.func @transform_1(%arg0: i32) -> (i32, i32) {
    %c0_i32 = arith.constant 0 : i32
    %c0_i32_0 = arith.constant 0 : i32
    %c0_i32_1 = arith.constant 0 : i32
    return %c0_i32, %c0_i32_0 : i32, i32
  }
  func.func @transform_2(%arg0: i32) -> (i32, i32) {
    %c0_i32 = arith.constant 0 : i32
    %c0_i32_0 = arith.constant 0 : i32
    %c0_i32_1 = arith.constant 0 : i32
    return %c0_i32, %c0_i32_0 : i32, i32
  }
  func.func @transform_3(%arg0: i32) -> (i32, i32) {
    %c0_i32 = arith.constant 0 : i32
    %c0_i32_0 = arith.constant 0 : i32
    %c0_i32_1 = arith.constant 0 : i32
    return %c0_i32, %c0_i32_0 : i32, i32
  }
  func.func @transform_4(%arg0: i32) -> (i32, i32) {
    %c0_i32 = arith.constant 0 : i32
    %c0_i32_0 = arith.constant 0 : i32
    %c0_i32_1 = arith.constant 0 : i32
    return %c0_i32, %c0_i32_0 : i32, i32
  }
  func.func @transform_5(%arg0: i32) -> (i32, i32) {
    %c0_i32 = arith.constant 0 : i32
    %c0_i32_0 = arith.constant 0 : i32
    %c0_i32_1 = arith.constant 0 : i32
    return %c0_i32, %c0_i32_0 : i32, i32
  }
  func.func @transform_6(%arg0: i32) -> (i32, i32) {
    %c0_i32 = arith.constant 0 : i32
    %c0_i32_0 = arith.constant 0 : i32
    %c0_i32_1 = arith.constant 0 : i32
    return %c0_i32, %c0_i32_0 : i32, i32
  }
}

</mosaic_0001>

<bundles_post_ra>
// kernel: tpu_custom_call.1
= control target key start
LH: loop header
LB: loop body
LE: loop exit
PB: predicated region body
PF: predicated region fallthrough
CT: control target
= control target key end

     0   :  { %11 = vsyncpa [#allocation3], 0  ;;  %s667_s0 = inlined_call_operand.hbm [shape: f32[8,128], index: 0, kind: input, shape index: {}]   ;;  %s668_s1 = inlined_call_operand.vmem [shape: f32[18,8], index: 1, kind: input, shape index: {}]   ;;  %s669_s2 = inlined_call_operand.vmem [shape: f32[16,128], index: 2, kind: input, shape index: {}]   ;;  %s670_s3 = inlined_call_operand.vmem [shape: f32[1,128], index: 3, kind: input, shape index: {}]   ;;  %s671_s4 = inlined_call_operand.vmem [shape: f32[16,128], index: 4, kind: input, shape index: {}]   ;;  %s672_s5 = inlined_call_operand.hbm [shape: f32[128,128], index: 5, kind: input, shape index: {}]   ;;  %s673_s6 = inlined_call_operand.hbm [shape: f32[16,128], index: 6, kind: output, shape index: {}]  }
   0x1   :  { %12 = vsyncpa [#allocation6], 0 }
   0x2   :  { %13 = vsyncpa [#allocation4], 0  ;;  %s532_s21 = smov [#allocation2]   ;;  %s533_s23 = smov [#allocation5]  }
   0x3   :  { %s20_s22 = sshll.u32 %s532_s21, 4  ;;  %s37_s24 = sshll.u32 %s533_s23, 4  ;;  %s21_s22 = int_to_ptr.vmem [resolvable:$true] %s20_s22  ;;  %s574_s24 = int_to_ptr.vmem [resolvable:$true] %s37_s24 }
   0x4   :  { %s460_s27 = scalar_lea.hbm %s667_s0, 128 }
   0x5   :  { %p461_p0 = scmp.ne.s32.totalorder %s667_s0, %s460_s27  ;;  %p464_p1 = scmp.lt.u32.totalorder %s460_s27, %s667_s0 }
   0x7   :  { %p466_p2 = pnand %p464_p1, %p461_p0 }
   0x9   :  { %469 = shalt.err (!%p466_p2)
}
   0xa   :  { %s470_s8 = scalar_lea.vmem %s21_s22, 128  ;;  %p475_p4 = scmp.lt.s32.totalorder %s21_s22, %s21_s22 }
   0xb   :  { %p471_p3 = scmp.ne.s32.totalorder %s21_s22, %s470_s8  ;;  %p476_p5 = scmp.lt.s32.totalorder %s470_s8, %s470_s8 }
   0xd   :  { %p477_p6 = por %p476_p5, %p475_p4 }
   0xf   :  { %p478_p7 = pnand %p477_p6, %p471_p3 }
  0x11   :  { %481 = shalt.err (!%p478_p7)
}
  0x12   :  { %23 = dma.hbm_to_vmem [thread:$0]  %s667_s0, 128, %s21_s22, [#allocation3]  }
  0x13   :  { %s482_s13 = scalar_lea.hbm %s672_s5, 2048 }
  0x14   :  { %p483_p8 = scmp.ne.s32.totalorder %s672_s5, %s482_s13  ;;  %p486_p9 = scmp.lt.u32.totalorder %s482_s13, %s672_s5 }
  0x16   :  { %p488_p10 = pnand %p486_p9, %p483_p8 }
  0x18   :  { %491 = shalt.err (!%p488_p10)
}
  0x19   :  { %s492_s18 = scalar_lea.vmem %s574_s24, 2048  ;;  %p497_p12 = scmp.lt.s32.totalorder %s574_s24, %s574_s24 }
  0x1a   :  { %p493_p11 = scmp.ne.s32.totalorder %s574_s24, %s492_s18  ;;  %p498_p13 = scmp.lt.s32.totalorder %s492_s18, %s492_s18 }
  0x1c   :  { %p499_p0 = por %p498_p13, %p497_p12 }
  0x1e   :  { %p500_p1 = pnand %p499_p0, %p493_p11 }
  0x20   :  { %503 = shalt.err (!%p500_p1)
}
  0x21   :  { %s534_s0 = smov 128   ;;  %s535_s19 = smov 8  }
  0x22   :  { %43 = dma.hbm_to_vmem [thread:$0]  %s672_s5, 2048, %s574_s24, [#allocation6], %s534_s0, %s534_s0, %s535_s19  }
  0x23   :  { %526 = dma.done.wait [#allocation3], 128  }
  0x24   :  { %527 = vsyncadd [#allocation3], 4294967168 }
  0x25   :  { %528 = dma.done.wait [#allocation6], 2048  }
  0x26   :  { %529 = vsyncadd [#allocation6], 4294965248  ;;  %v536_v0 = vmov 0.0   ;;  %vm537_vm0 = vmmov 0   ;;  %vm54_vm1 = vcmask 64512   ;;  %v53_v1 = vld [vmem:[#allocation2] sm:$0xff]  ;;  %v146_v29 = vlaneseq }
  0x27   :  { %363 = vmatprep.subr.mxu0 %v536_v0  ;;  %365 = vmatprep.mubr.msk.f32.mxu0 %vm537_vm0, %v536_v0  ;;  %v50_v2 = vld [vmem:[%s668_s1] sm:$0xff]  ;;  %v152_v3 = vld [vmem:[#allocation5] sm:$0xff]  ;;  %v153_v4 = vld [vmem:[#allocation5 + $0x8] sm:$0xff] }
  0x28   :  { %364 = vmatpush3.msra.mxu0 %v53_v1  ;;  %v409_v5 = vpack.c.bf16 %v153_v4, %v152_v3  ;;  %v154_v6 = vld [vmem:[#allocation5 + $0x10] sm:$0xff]  ;;  %v155_v7 = vld [vmem:[#allocation5 + $0x18] sm:$0xff]  ;;  %v51_v8 = vld [vmem:[%s668_s1 + $0x8] sm:$0xff]  ;;  %v625_v32 = vshrl.u32 %v146_v29, 7 }
  0x29   :  { %366 = vmatmul.mubr.msk.f32.vlgmr.msra.gmra.mrb[0].mxu0 %vm54_vm1, %v50_v2  ;;  %v413_v9 = vpack.c.bf16 %v155_v7, %v154_v6  ;;  %v156_v10 = vld [vmem:[#allocation5 + $0x20] sm:$0xff]  ;;  %v157_v11 = vld [vmem:[#allocation5 + $0x28] sm:$0xff]  ;;  %v158_v14 = vld [vmem:[#allocation5 + $0x30] sm:$0xff] }
  0x2a   :  { %368 = vmatprep.mubr.msk.f32.mxu0 %vm537_vm0, %v536_v0  ;;  %410 = vmatprep.subr.bf16.mxu1 %v409_v5  ;;  %v417_v12 = vpack.c.bf16 %v157_v11, %v156_v10  ;;  %v52_v13 = vld [vmem:[%s668_s1 + $0x10] sm:$0x3]  ;;  %v159_v15 = vld [vmem:[#allocation5 + $0x38] sm:$0xff]  ;;  %v160_v17 = vld [vmem:[#allocation5 + $0x40] sm:$0xff]  ;;  %v148_v35 = vsub.s32 1, %v625_v32  ;;  %v245_v36 = vsub.s32 0, %v625_v32 }
  0x2b   :  { %412 = vmatpush3.bf16.msra.mxu1 %v409_v5  ;;  %v421_v16 = vpack.c.bf16 %v159_v15, %v158_v14  ;;  %v161_v18 = vld [vmem:[#allocation5 + $0x48] sm:$0xff]  ;;  %v162_v20 = vld [vmem:[#allocation5 + $0x50] sm:$0xff]  ;;  %v163_v21 = vld [vmem:[#allocation5 + $0x58] sm:$0xff] }
  0x2c   :  { %414 = vmatprep.subr.bf16.mxu1 %v413_v9  ;;  %v425_v19 = vpack.c.bf16 %v161_v18, %v160_v17  ;;  %v429_v22 = vpack.c.bf16 %v163_v21, %v162_v20  ;;  %v164_v23 = vld [vmem:[#allocation5 + $0x60] sm:$0xff]  ;;  %v165_v24 = vld [vmem:[#allocation5 + $0x68] sm:$0xff]  ;;  %v166_v26 = vld [vmem:[#allocation5 + $0x70] sm:$0xff] }
  0x2d   :  { %369 = vmatmul.mubr.msk.f32.gmra.mrb[2].mxu0 %vm54_vm1, %v51_v8  ;;  %v433_v25 = vpack.c.bf16 %v165_v24, %v164_v23  ;;  %v167_v27 = vld [vmem:[#allocation5 + $0x78] sm:$0xff]  ;;  %v145_v39 = vld [vmem:[%s671_s4 + $0x8] sm:$0xff] }
  0x2e   :  { %371 = vmatprep.mubr.msk.f32.mxu0 %vm537_vm0, %v536_v0  ;;  %v437_v28 = vpack.c.bf16 %v167_v27, %v166_v26  ;;  %v144_v38 = vld [vmem:[%s671_s4] sm:$0xff]  ;;  %v256_v46 = vld [vmem:[%s669_s2 + $0x8] sm:$0xff] }
  0x2f   :  { %416 = vmatpush3.bf16.msra.mxu1 %v413_v9  ;;  %v255_v49 = vld [vmem:[%s669_s2] sm:$0xff]  ;;  %vm258_vm3 = vcmp.gt.f32.partialorder %v256_v46, 0.0 }
  0x30   :  { %418 = vmatprep.subr.bf16.mxu1 %v417_v12  ;;  %vm257_vm5 = vcmp.gt.f32.partialorder %v255_v49, 0.0  ;;  %v288_v0 = vld [vmem:[%s670_s3] sm:$0x1]  ;;  %s538_s3 = smov [#allocation7]  }
  0x31   :  { %372 = vmatmul.mubr.msk.f32.gmra.mrb[4].mxu0 %vm54_vm1, %v52_v13  ;;  %vm289_vm7 = vcmp.gt.f32.partialorder %v288_v0, 0.0  ;;  %s323_s10 = sshll.u32 %s538_s3, 4  ;;  %s324_s10 = int_to_ptr.vmem [resolvable:$true] %s323_s10 }
  0x32   :  { %s504_s11 = scalar_lea.vmem %s324_s10, 256  ;;  %p509_p3 = scmp.lt.s32.totalorder %s324_s10, %s324_s10 }
  0x33   :  { %420 = vmatpush3.bf16.msra.mxu1 %v417_v12  ;;  %p505_p2 = scmp.ne.s32.totalorder %s324_s10, %s504_s11  ;;  %p510_p4 = scmp.lt.s32.totalorder %s504_s11, %s504_s11 }
  0x34   :  { %422 = vmatprep.subr.bf16.mxu1 %v421_v16 }
  0x35   :  { %p511_p5 = por %p510_p4, %p509_p3 }
  0x37   :  { %424 = vmatpush3.bf16.msra.mxu1 %v421_v16  ;;  %p512_p6 = pnand %p511_p5, %p505_p2 }
  0x38   :  { %426 = vmatprep.subr.bf16.mxu1 %v425_v19 }
  0x3b   :  { %428 = vmatpush3.bf16.msra.mxu1 %v425_v19 }
  0x3c   :  { %430 = vmatprep.subr.bf16.mxu1 %v429_v22 }
  0x3f   :  { %432 = vmatpush3.bf16.msra.mxu1 %v429_v22 }
  0x40   :  { %434 = vmatprep.subr.bf16.mxu1 %v433_v25 }
  0x43   :  { %436 = vmatpush3.bf16.msra.mxu1 %v433_v25 }
  0x44   :  { %438 = vmatprep.subr.bf16.mxu1 %v437_v28 }
  0x47   :  { %440 = vmatpush3.bf16.msra.mxu1 %v437_v28 }
  0xfc   :  { %v623_v30 = vpop.f32.mrb[0].mxu0 }
  0xfd   :  { %v367_v31 = vpop.f32.mrb[1].mxu0 }
 0x100   :  { %v627_v33 = vpop.f32.mrb[2].mxu0 }
 0x101   :  { %v370_v34 = vpop.f32.mrb[3].mxu0 }
 0x104   :  { %v140_v37 = vpop.f32.mrb[4].mxu0 }
 0x105   :  { %v373_v40 = vpop.f32.mrb[5].mxu0  ;;  %v149_v41 = vrot.slane %v140_v37, %v148_v35  ;;  %v246_v42 = vrot.slane %v140_v37, %v245_v36  ;;  %v282_v54 = vrot.slane %v140_v37, 1 }
 0x107   :  { %v150_v43 = vmul.f32 %v149_v41, %v144_v38  ;;  %v151_v44 = vmul.f32 %v149_v41, %v145_v39  ;;  %v284_v59 = vadd.f32 %v282_v54, %v140_v37 }
 0x109   :  { %406 = vmatprep.mubr.f32.mxu1 %v150_v43  ;;  %v286_v62 = vmul.f32 0.2, %v284_v59  ;;  %vm285_vm6 = vcmp.gt.f32.partialorder %v284_v59, 0.0 }
 0x10a   :  { %407 = vmatmul.mubr.f32.vlgmr.msra.gmra.mrb[0].mxu1 %v151_v44 }
 0x10b   :  { %v287_v2 = vsel %vm285_vm6, %v284_v59, %v286_v62 }
 0x10c   :  { %v290_v5 = vsel %vm289_vm7, %v287_v2, -9e+15 }
 0x1dd   :  { %v408_v45 = vpop.f32.mrb[0].mxu1 }
 0x1de   :  { %v248_v47 = vadd.f32 %v408_v45, %v246_v42  ;;  %v234_v48 = vpop.f32.mrb[1].mxu1 }
 0x1df   :  { %v247_v50 = vadd.f32 %v246_v42, %v234_v48 }
 0x1e0   :  { %vm250_vm2 = vcmp.gt.f32.partialorder %v248_v47, 0.0  ;;  %v252_v51 = vmul.f32 0.2, %v248_v47 }
 0x1e1   :  { %vm249_vm4 = vcmp.gt.f32.partialorder %v247_v50, 0.0  ;;  %v251_v52 = vmul.f32 0.2, %v247_v50 }
 0x1e2   :  { %v254_v53 = vsel %vm250_vm2, %v248_v47, %v252_v51 }
 0x1e3   :  { %v260_v55 = vsel %vm258_vm3, %v254_v53, -9e+15  ;;  %v253_v56 = vsel %vm249_vm4, %v247_v50, %v251_v52 }
 0x1e4   :  { %v259_v57 = vsel %vm257_vm5, %v253_v56, -9e+15 }
 0x1e5   :  { %v261_v58 = vmax.f32 %v259_v57, %v260_v55 }
 0x1e7   :  { %v262_v60 = vrot.slane %v261_v58, 4 }
 0x1e9   :  { %v263_v61 = vmax.f32 %v261_v58, %v262_v60 }
 0x1eb   :  { %v264_v63 = vrot.slane %v263_v61, 2 }
 0x1ed   :  { %v265_v1 = vmax.f32 %v263_v61, %v264_v63 }
 0x1ef   :  { %v266_v3 = vrot.slane %v265_v1, 1 }
 0x1f1   :  { %v267_v4 = vmax.f32 %v265_v1, %v266_v3 }
 0x1f3   :  { %v268_v6 = vsub.f32 %v259_v57, %v267_v4  ;;  %v269_v7 = vsub.f32 %v260_v55, %v267_v4  ;;  %v291_v8 = vsub.f32 %v290_v5, %v267_v4 }
 0x1f5   :  { %v270_v9 = vmul.f32 1.442695, %v268_v6  ;;  %v272_v10 = vmul.f32 1.442695, %v269_v7  ;;  %v292_v18 = vmul.f32 1.442695, %v291_v8 }
 0x1f7   :  { %448 = vpow2.f32 %v270_v9 }
 0x1f8   :  { %450 = vpow2.f32 %v272_v10 }
 0x1f9   :  { %452 = vpow2.f32 %v292_v18 }
 0x201   :  { %v449_v11 = vpop.eup %448 }
 0x202   :  { %v451_v12 = vpop.eup %450 }
 0x203   :  { %v274_v13 = vadd.f32 %v451_v12, %v449_v11  ;;  %v453_v21 = vpop.eup %452 }
 0x205   :  { %v275_v14 = vrot.slane %v274_v13, 4 }
 0x207   :  { %v276_v15 = vadd.f32 %v275_v14, %v274_v13 }
 0x209   :  { %v277_v16 = vrot.slane %v276_v15, 2 }
 0x20b   :  { %v278_v17 = vadd.f32 %v277_v16, %v276_v15 }
 0x20d   :  { %v279_v19 = vrot.slane %v278_v17, 1 }
 0x20f   :  { %v280_v20 = vadd.f32 %v279_v19, %v278_v17 }
 0x211   :  { %454 = vrcp.f32 %v280_v20 }
 0x21b   :  { %v455_v22 = vpop.eup %454 }
 0x21c   :  { %v295_v23 = vmul.f32 %v455_v22, %v453_v21 }
 0x21e   :  { %v300_v24 = vrot.slane %v295_v23, %v245_v36 }
 0x220   :  { %v302_v25 = vmul.f32 %v300_v24, %v623_v30  ;;  %v303_v26 = vmul.f32 %v300_v24, %v627_v33 }
 0x222   :  { %v306_v27 = vmin.f32 %v302_v25, 0.0  ;;  %v307_v28 = vmin.f32 %v303_v26, 0.0  ;;  %vm304_vm8 = vcmp.gt.f32.partialorder %v302_v25, 0.0  ;;  %vm305_vm9 = vcmp.gt.f32.partialorder %v303_v26, 0.0 }
 0x224   :  { %v308_v29 = vmul.f32 1.442695, %v306_v27  ;;  %v310_v31 = vmul.f32 1.442695, %v307_v28 }
 0x226   :  { %456 = vpow2.f32 %v308_v29 }
 0x227   :  { %458 = vpow2.f32 %v310_v31 }
 0x230   :  { %v457_v34 = vpop.eup %456 }
 0x231   :  { %v459_v35 = vpop.eup %458  ;;  %v339_v37 = vadd.f32 -1.0, %v457_v34 }
 0x232   :  { %v340_v38 = vadd.f32 -1.0, %v459_v35 }
 0x233   :  { %v314_v32 = vsel %vm304_vm8, %v302_v25, %v339_v37 }
 0x234   :  { %v315_v36 = vsel %vm305_vm9, %v303_v26, %v340_v38  ;;  %316 = vst [vmem:[#allocation7] sm:$0xff] %v314_v32 }
 0x235   :  { %317 = vst [vmem:[#allocation7 + $0x8] sm:$0xff] %v315_v36 }
 0x236   :  { %515 = shalt.err (!%p512_p6)
}
 0x237   :  { %s516_s14 = scalar_lea.hbm %s673_s6, 256 }
 0x238   :  { %p517_p7 = scmp.ne.s32.totalorder %s673_s6, %s516_s14  ;;  %p520_p8 = scmp.lt.u32.totalorder %s516_s14, %s673_s6 }
 0x23a   :  { %p522_p9 = pnand %p520_p8, %p517_p7 }
 0x23c   :  { %525 = shalt.err (!%p522_p9)
}
 0x23d   :  { %329 = dma.vmem_to_hbm [thread:$0]  %s324_s10, 256, %s673_s6, [#allocation4], %s534_s0, %s534_s0, %s535_s19  }
 0x23e   :  { %530 = dma.done.wait [#allocation4], 256  }
 0x23f   :  { %531 = vsyncadd [#allocation4], 4294967040 }
 0x240   :  { %333 = vsyncpa [#allocation3], 1 }
 0x241   :  { %334 = vsyncpa [#allocation6], 1 }
 0x242   :  { %335 = vsyncpa [#allocation4], 1 }

</bundles_post_ra>
